<compile_context>
chip_gen: v7x
topology: tpu7x:2x2x1
jax: 0.10.0
libtpu: 0.0.40
codegen_flags: <defaults>
</compile_context>

<pallas_src>
import jax
import jax.numpy as jnp
from jax.experimental import pallas as pl
from jax.experimental.pallas import tpu as pltpu

EPS = 1e-5


def _residual_block_kernel(x_ref, wcat_ref, pvec_ref, o_ref):
    x = x_ref[...]                                            # (N, in_dim) f32

    # One fused, lane-dense matmul: [fc | projection] = x @ [W_fc | W_proj].
    fused = jnp.dot(
        x, wcat_ref[...],
        preferred_element_type=jnp.float32,
        precision=jax.lax.Precision.HIGHEST,
    )                                                         # (N, 2*out_dim) f32

    out_dim = o_ref.shape[1]
    out = fused[:, :out_dim]      # fc path (b_fc cancelled by training-mode BN centering)
    res = fused[:, out_dim:]      # projection path (its bias added in the epilogue)

    b_proj = pvec_ref[0:1, :]     # (1, out_dim)
    gamma  = pvec_ref[1:2, :]
    beta   = pvec_ref[2:3, :]

    # BatchNorm1d (training mode): biased batch stats over axis 0, folded into a
    # single affine — no materialized `centered` tensor.
    n = out.shape[0]
    inv_n = 1.0 / n
    mean = jnp.sum(out, axis=0, keepdims=True) * inv_n                # (1, out_dim)
    ex2  = jnp.sum(out * out, axis=0, keepdims=True) * inv_n
    var  = ex2 - mean * mean
    scale = gamma * jax.lax.rsqrt(var + EPS)                          # gamma folded in
    shift = beta - mean * scale
    bn = out * scale + shift

    # ReLU, then add the projection residual (with its bias).
    act = jnp.maximum(bn, 0.0)
    o_ref[...] = (act + res + b_proj).astype(o_ref.dtype)


def prepare_residual_block_params(w_fc, b_fc, w_proj, b_proj, gamma, beta):
    """One-time parameter prep (call ONCE, reuse across forward calls).

    Weights are pre-transposed (in_dim, out_dim); biases/gamma/beta are (1, out_dim).
    b_fc is accepted for API parity but dropped: training-mode BatchNorm centering
    cancels it exactly. (Eval-mode running-stats BN would NOT cancel it.)
    """
    del b_fc
    w_cat = jnp.concatenate([w_fc, w_proj], axis=1)           # (in_dim, 2*out_dim)
    pvec = jnp.concatenate([b_proj, gamma, beta], axis=0)     # (3, out_dim)
    return w_cat, pvec


def residual_block(x, w_cat, pvec):
    """Per-call path: no packing/concat work here, just the pallas_call."""
    N, in_dim = x.shape
    out_dim = pvec.shape[1]

    cost = pl.CostEstimate(
        flops=2 * N * in_dim * (2 * out_dim) + 10 * N * out_dim,
        transcendentals=0,
        bytes_accessed=4 * (x.size + w_cat.size + pvec.size + N * out_dim),
    )

    return pl.pallas_call(
        _residual_block_kernel,
        out_shape=jax.ShapeDtypeStruct((N, out_dim), jnp.float32),
        in_specs=[pl.BlockSpec(memory_space=pltpu.VMEM)] * 3,
        out_specs=pl.BlockSpec(memory_space=pltpu.VMEM),
        cost_estimate=cost,
    )(x, w_cat, pvec)


def _reference(x, w_fc, b_fc, w_proj, b_proj, gamma, beta):
    out = x @ w_fc + b_fc
    mean = out.mean(axis=0, keepdims=True)
    var = ((out - mean) ** 2).mean(axis=0, keepdims=True)
    out = gamma * (out - mean) / jnp.sqrt(var + EPS) + beta
    out = jnp.maximum(out, 0.0)
    res = x @ w_proj + b_proj
    return out + res


if __name__ == "__main__":
    # Small shapes consistent with the module: batch=8, in_dim=32, out_dim=64
    # (in_dim != out_dim so the projection branch is exercised).
    N, in_dim, out_dim = 8, 32, 64

    key = jax.random.PRNGKey(0)
    k = jax.random.split(key, 7)
    x      = jax.random.normal(k[0], (N, in_dim), dtype=jnp.float32)
    w_fc   = jax.random.normal(k[1], (in_dim, out_dim), dtype=jnp.float32) * 0.1
    b_fc   = jax.random.normal(k[2], (1, out_dim), dtype=jnp.float32) * 0.1
    w_proj = jax.random.normal(k[3], (in_dim, out_dim), dtype=jnp.float32) * 0.1
    b_proj = jax.random.normal(k[4], (1, out_dim), dtype=jnp.float32) * 0.1
    # BatchNorm1d default init: weight=1, bias=0.
    gamma  = jnp.ones((1, out_dim), dtype=jnp.float32)
    beta   = jnp.zeros((1, out_dim), dtype=jnp.float32)

    # Parameter prep happens ONCE (hoisted out of the per-call path).
    w_cat, pvec = prepare_residual_block_params(w_fc, b_fc, w_proj, b_proj, gamma, beta)
    w_cat, pvec = jax.block_until_ready((w_cat, pvec))

    y = residual_block(x, w_cat, pvec)
    jax.block_until_ready(y)

    # Reference keeps b_fc explicitly; the kernel drops it (training-mode BN
    # centering cancels it) — results must still agree to fp tolerance.
    y_ref = _reference(x, w_fc, b_fc, w_proj, b_proj, gamma, beta)
    assert y.shape == (N, out_dim)
    assert jnp.allclose(y, y_ref, atol=1e-4, rtol=1e-4), "mismatch vs JAX reference"

    print("KERNEL_OK")
</pallas_src>

<mosaic_0001>
module attributes {stable_mosaic.version = 11 : i64} {
  func.func @_residual_block_kernel(%arg0: memref<8x32xf32, #tpu.memory_space<vmem>>, %arg1: memref<32x128xf32, #tpu.memory_space<vmem>>, %arg2: memref<3x64xf32, #tpu.memory_space<vmem>>, %arg3: memref<8x64xf32, #tpu.memory_space<vmem>>) attributes {dimension_semantics = [], scalar_prefetch = 0 : i64, scratch_operands = 0 : i64, tpu.core_type = #tpu.core_type<tc>} {
    %c0 = arith.constant 0 : index
    %c0_0 = arith.constant 0 : index
    %0 = vector.load %arg0[%c0, %c0_0] : memref<8x32xf32, #tpu.memory_space<vmem>>, vector<8x32xf32>
    %c0_1 = arith.constant 0 : index
    %c0_2 = arith.constant 0 : index
    %1 = vector.load %arg1[%c0_1, %c0_2] : memref<32x128xf32, #tpu.memory_space<vmem>>, vector<32x128xf32>
    %cst = arith.constant dense<0.000000e+00> : vector<8x128xf32>
    %2 = tpu.matmul %0, %1, %cst {dimension_numbers = #tpu.dot_dimension_numbers<[1], [0], [0], [1], [0, 0, 1, 1], [], []>, precision = #tpu.contract_precision<fp32>} : vector<8x32xf32>, vector<32x128xf32>, vector<8x128xf32> -> vector<8x128xf32>
    %3 = vector.extract_strided_slice %2 {offsets = [0, 0], sizes = [8, 64], strides = [1, 1]} : vector<8x128xf32> to vector<8x64xf32>
    %4 = vector.extract_strided_slice %2 {offsets = [0, 64], sizes = [8, 64], strides = [1, 1]} : vector<8x128xf32> to vector<8x64xf32>
    %c0_3 = arith.constant 0 : index
    %c0_4 = arith.constant 0 : index
    %5 = vector.load %arg2[%c0_3, %c0_4] : memref<3x64xf32, #tpu.memory_space<vmem>>, vector<1x64xf32>
    %c1 = arith.constant 1 : index
    %c0_5 = arith.constant 0 : index
    %6 = vector.load %arg2[%c1, %c0_5] : memref<3x64xf32, #tpu.memory_space<vmem>>, vector<1x64xf32>
    %c2 = arith.constant 2 : index
    %c0_6 = arith.constant 0 : index
    %7 = vector.load %arg2[%c2, %c0_6] : memref<3x64xf32, #tpu.memory_space<vmem>>, vector<1x64xf32>
    %cst_7 = arith.constant dense<0.000000e+00> : vector<64xf32>
    %8 = vector.multi_reduction <add>, %3, %cst_7 [0] : vector<8x64xf32> to vector<64xf32>
    %9 = vector.shape_cast %8 : vector<64xf32> to vector<1x64xf32>
    %cst_8 = arith.constant 1.250000e-01 : f32
    %10 = vector.broadcast %cst_8 : f32 to vector<1x64xf32>
    %11 = arith.mulf %9, %10 : vector<1x64xf32>
    %12 = arith.mulf %3, %3 : vector<8x64xf32>
    %cst_9 = arith.constant dense<0.000000e+00> : vector<64xf32>
    %13 = vector.multi_reduction <add>, %12, %cst_9 [0] : vector<8x64xf32> to vector<64xf32>
    %14 = vector.shape_cast %13 : vector<64xf32> to vector<1x64xf32>
    %cst_10 = arith.constant 1.250000e-01 : f32
    %15 = vector.broadcast %cst_10 : f32 to vector<1x64xf32>
    %16 = arith.mulf %14, %15 : vector<1x64xf32>
    %17 = arith.mulf %11, %11 : vector<1x64xf32>
    %18 = arith.subf %16, %17 : vector<1x64xf32>
    %cst_11 = arith.constant 9.99999974E-6 : f32
    %19 = vector.broadcast %cst_11 : f32 to vector<1x64xf32>
    %20 = arith.addf %18, %19 : vector<1x64xf32>
    %21 = math.rsqrt %20 : vector<1x64xf32>
    %22 = arith.mulf %6, %21 : vector<1x64xf32>
    %23 = arith.mulf %11, %22 : vector<1x64xf32>
    %24 = arith.subf %7, %23 : vector<1x64xf32>
    %25 = vector.broadcast %22 : vector<1x64xf32> to vector<8x64xf32>
    %26 = arith.mulf %3, %25 : vector<8x64xf32>
    %27 = vector.broadcast %24 : vector<1x64xf32> to vector<8x64xf32>
    %28 = arith.addf %26, %27 : vector<8x64xf32>
    %cst_12 = arith.constant 0.000000e+00 : f32
    %29 = vector.broadcast %cst_12 : f32 to vector<8x64xf32>
    %30 = arith.maximumf %28, %29 : vector<8x64xf32>
    %31 = arith.addf %30, %4 : vector<8x64xf32>
    %32 = vector.broadcast %5 : vector<1x64xf32> to vector<8x64xf32>
    %33 = arith.addf %31, %32 : vector<8x64xf32>
    %c0_13 = arith.constant 0 : index
    %c0_14 = arith.constant 0 : index
    %34 = vector.load %arg3[%c0_13, %c0_14] : memref<8x64xf32, #tpu.memory_space<vmem>>, vector<8x64xf32>
    tpu.vector_store %arg3[%c0_13, %c0_14], %33 {strides = array<i32>} : memref<8x64xf32, #tpu.memory_space<vmem>>, vector<8x64xf32>,
    return
  }
}

</mosaic_0001>

<bundles_post_ra>
// kernel: tpu_custom_call.1
= control target key start
LH: loop header
LB: loop body
LE: loop exit
PB: predicated region body
PF: predicated region fallthrough
CT: control target
= control target key end

     0   :  { %8 = vsyncpa [#allocation3], 0  ;;  %s934_s0 = inlined_call_operand.hbm [shape: f32[8,32], index: 0, kind: input, shape index: {}]   ;;  %s935_s1 = inlined_call_operand.hbm [shape: f32[32,128], index: 1, kind: input, shape index: {}]   ;;  %s936_s2 = inlined_call_operand.vmem [shape: f32[3,64], index: 2, kind: input, shape index: {}]   ;;  %s937_s3 = inlined_call_operand.hbm [shape: f32[8,64], index: 3, kind: output, shape index: {}]  }
   0x1   :  { %9 = vsyncpa [#allocation6], 0 }
   0x2   :  { %10 = vsyncpa [#allocation4], 0  ;;  %s826_s12 = smov [#allocation2]   ;;  %s827_s14 = smov [#allocation5]  }
   0x3   :  { %s17_s13 = sshll.u32 %s826_s12, 4  ;;  %s26_s15 = sshll.u32 %s827_s14, 4  ;;  %s18_s13 = int_to_ptr.vmem [resolvable:$true] %s17_s13  ;;  %s855_s15 = int_to_ptr.vmem [resolvable:$true] %s26_s15 }
   0x4   :  { %s754_s18 = scalar_lea.hbm %s934_s0, 128 }
   0x5   :  { %p755_p0 = scmp.ne.s32.totalorder %s934_s0, %s754_s18  ;;  %p758_p1 = scmp.lt.u32.totalorder %s754_s18, %s934_s0 }
   0x7   :  { %p760_p2 = pnand %p758_p1, %p755_p0 }
   0x9   :  { %763 = shalt.err (!%p760_p2)
}
   0xa   :  { %s764_s23 = scalar_lea.vmem %s18_s13, 128  ;;  %p769_p4 = scmp.lt.s32.totalorder %s18_s13, %s18_s13 }
   0xb   :  { %p765_p3 = scmp.ne.s32.totalorder %s18_s13, %s764_s23  ;;  %p770_p5 = scmp.lt.s32.totalorder %s764_s23, %s764_s23 }
   0xd   :  { %p771_p6 = por %p770_p5, %p769_p4 }
   0xf   :  { %p772_p7 = pnand %p771_p6, %p765_p3 }
  0x11   :  { %775 = shalt.err (!%p772_p7)
}
  0x12   :  { %20 = dma.hbm_to_vmem [thread:$0]  %s934_s0, 128, %s18_s13, [#allocation3]  }
  0x13   :  { %s776_s28 = scalar_lea.hbm %s935_s1, 512 }
  0x14   :  { %p777_p8 = scmp.ne.s32.totalorder %s935_s1, %s776_s28  ;;  %p780_p9 = scmp.lt.u32.totalorder %s776_s28, %s935_s1 }
  0x16   :  { %p782_p10 = pnand %p780_p9, %p777_p8 }
  0x18   :  { %785 = shalt.err (!%p782_p10)
}
  0x19   :  { %s786_s6 = scalar_lea.vmem %s855_s15, 512  ;;  %p791_p12 = scmp.lt.s32.totalorder %s855_s15, %s855_s15 }
  0x1a   :  { %p787_p11 = scmp.ne.s32.totalorder %s855_s15, %s786_s6  ;;  %p792_p13 = scmp.lt.s32.totalorder %s786_s6, %s786_s6 }
  0x1c   :  { %p793_p0 = por %p792_p13, %p791_p12 }
  0x1e   :  { %p794_p1 = pnand %p793_p0, %p787_p11 }
  0x20   :  { %797 = shalt.err (!%p794_p1)
}
  0x21   :  { %s828_s0 = smov 128   ;;  %s829_s7 = smov 8  }
  0x22   :  { %32 = dma.hbm_to_vmem [thread:$0]  %s935_s1, 512, %s855_s15, [#allocation6], %s828_s0, %s828_s0, %s829_s7  }
  0x23   :  { %820 = dma.done.wait [#allocation3], 128  }
  0x24   :  { %821 = vsyncadd [#allocation3], 4294967168 }
  0x25   :  { %822 = dma.done.wait [#allocation6], 512  }
  0x26   :  { %823 = vsyncadd [#allocation6], 4294966784  ;;  %v830_v0 = vmov 0.0|0.0   ;;  %vm831_vm0 = vmmov 0   ;;  %v832_v1 = vmov 0.0   ;;  %vm46_vm1 = vcmask 261120  }
  0x27   :  { %698 = vmatprep.subr.bf16.mxu1 %v830_v0  ;;  %716 = vmatprep.subr.bf16.mxu0 %v830_v0  ;;  %v42_v2 = vld [vmem:[#allocation5] sm:$0xff]  ;;  %v43_v3 = vld [vmem:[#allocation5 + $0x8] sm:$0xff]  ;;  %v44_v4 = vld [vmem:[#allocation5 + $0x10] sm:$0xff]  ;;  %s833_s1 = smov 64   ;;  %vm538_vm2 = vcmask 523264   ;;  %s834_s16 = smov [#allocation7]  }
  0x28   :  { %640 = vmatprep.mubr.msk.f32.mxu1 %vm831_vm0, %v832_v1  ;;  %673 = vmatprep.mubr.msk.f32.mxu0 %vm831_vm0, %v832_v1  ;;  %v51_v5 = vand.u32 4294901760, %v42_v2  ;;  %v54_v6 = vand.u32 4294901760, %v43_v3  ;;  %v45_v7 = vld [vmem:[#allocation5 + $0x18] sm:$0xff]  ;;  %v57_v8 = vand.u32 4294901760, %v44_v4  ;;  %s591_s17 = sshll.u32 %s834_s16, 4  ;;  %s592_s17 = int_to_ptr.vmem [resolvable:$true] %s591_s17 }
  0x29   :  { %v41_v9 = vld [vmem:[#allocation2] sm:$0xff]  ;;  %v60_v10 = vand.u32 4294901760, %v45_v7  ;;  %s798_s18 = scalar_lea.vmem %s592_s17, 128  ;;  %p803_p3 = scmp.lt.s32.totalorder %s592_s17, %s592_s17 }
  0x2a   :  { %v48_v11 = vsel %vm46_vm1, %v41_v9, 0  ;;  %v699_v12 = vpack.c.bf16 %v54_v6, %v51_v5  ;;  %v131_v13 = vsub.f32 %v42_v2, %v51_v5  ;;  %v138_v14 = vsub.f32 %v43_v3, %v54_v6  ;;  %v536_v3 = vld [vmem:[%s936_s2 + $0x1] sm:$0x1]  ;;  %p799_p2 = scmp.ne.s32.totalorder %s592_s17, %s798_s18  ;;  %p804_p4 = scmp.lt.s32.totalorder %s798_s18, %s798_s18 }
  0x2b   :  { %v145_v15 = vsub.f32 %v44_v4, %v57_v8  ;;  %v152_v16 = vsub.f32 %v45_v7, %v60_v10  ;;  %v119_v17 = vand.u32 4294901760, %v48_v11  ;;  %v702_v18 = vpack.c.bf16 %v60_v10, %v57_v8  ;;  %v537_v8 = vld [vmem:[%s936_s2 + $0x2] sm:$0x1] }
  0x2c   :  { %700 = vmatpush3.bf16.msra.mxu1 %v699_v12  ;;  %718 = vmatpush3.bf16.msra.mxu0 %v699_v12  ;;  %v132_v19 = vand.u32 4294901760, %v131_v13  ;;  %v139_v20 = vand.u32 4294901760, %v138_v14  ;;  %v711_v39 = vpack.c.bf16 %v138_v14, %v131_v13  ;;  %v563_v4 = vlaneseq  ;;  %p805_p5 = por %p804_p4, %p803_p3 }
  0x2d   :  { %v146_v21 = vand.u32 4294901760, %v145_v15  ;;  %701 = vmatprep.subr.bf16.mxu1 %v830_v0  ;;  %719 = vmatprep.subr.bf16.mxu0 %v830_v0  ;;  %v120_v22 = vsub.f32 %v48_v11, %v119_v17  ;;  %v153_v23 = vand.u32 4294901760, %v152_v16  ;;  %v714_v40 = vpack.c.bf16 %v152_v16, %v145_v15 }
  0x2e   :  { %v133_v24 = vsub.f32 %v131_v13, %v132_v19  ;;  %v140_v25 = vsub.f32 %v138_v14, %v139_v20  ;;  %v723_v31 = vpack.c.bf16 %v139_v20, %v132_v19  ;;  %v564_v6 = vshrl.u32 %v563_v4, 7  ;;  %p806_p6 = pnand %p805_p5, %p799_p2 }
  0x2f   :  { %v147_v26 = vsub.f32 %v145_v15, %v146_v21  ;;  %v121_v27 = vand.u32 4294901760, %v120_v22  ;;  %v154_v28 = vsub.f32 %v152_v16, %v153_v23  ;;  %v726_v37 = vpack.c.bf16 %v153_v23, %v146_v21  ;;  %v601_v16 = vld [vmem:[%s936_s2] ss:$0 sm:$0xff] }
  0x30   :  { %703 = vmatpush3.bf16.msra.mxu1 %v702_v18  ;;  %721 = vmatpush3.bf16.msra.mxu0 %v702_v18  ;;  %v134_v29 = vand.u32 4294901760, %v133_v24  ;;  %v141_v30 = vand.u32 4294901760, %v140_v25  ;;  %v565_v9 = vsub.s32 0, %v564_v6 }
  0x31   :  { %v122_v32 = vsub.f32 %v120_v22, %v121_v27  ;;  %704 = vmatprep.subr.bf16.mxu1 %v830_v0  ;;  %722 = vmatprep.subr.bf16.mxu0 %v830_v0  ;;  %v148_v34 = vand.u32 4294901760, %v147_v26  ;;  %v155_v35 = vand.u32 4294901760, %v154_v28 }
  0x32   :  { %v705_v33 = vpack.c.bf16 %v141_v30, %v134_v29 }
  0x33   :  { %v123_v36 = vand.u32 4294901760, %v122_v32  ;;  %674 = vmatmul.mubr.f32.vlgmr.msra.gmra.mrb[0].mxu0 %v121_v27  ;;  %v708_v38 = vpack.c.bf16 %v155_v35, %v148_v34 }
  0x34   :  { %724 = vmatpush3.bf16.msra.mxu0 %v723_v31  ;;  %684 = vmatprep.mubr.msk.f32.mxu0 %vm831_vm0, %v832_v1 }
  0x35   :  { %641 = vmatmul.mubr.f32.vlgmr.msra.gmra.mrb[0].mxu1 %v123_v36  ;;  %725 = vmatprep.subr.bf16.mxu0 %v830_v0 }
  0x36   :  { %706 = vmatpush3.bf16.msra.mxu1 %v705_v33  ;;  %651 = vmatprep.mubr.msk.f32.mxu1 %vm831_vm0, %v832_v1 }
  0x37   :  { %707 = vmatprep.subr.bf16.mxu1 %v830_v0 }
  0x38   :  { %727 = vmatpush3.bf16.msra.mxu0 %v726_v37 }
  0x39   :  { %728 = vmatprep.subr.bf16.mxu0 %v830_v0 }
  0x3a   :  { %709 = vmatpush3.bf16.msra.mxu1 %v708_v38 }
  0x3b   :  { %710 = vmatprep.subr.bf16.mxu1 %v830_v0  ;;  %685 = vmatmul.mubr.f32.vlgmr.msra.gmra.mrb[0].mxu0 %v119_v17 }
  0x3c   :  { %730 = vmatpush3.bf16.msra.mxu0 %v699_v12  ;;  %695 = vmatprep.mubr.msk.f32.mxu0 %vm831_vm0, %v832_v1 }
  0x3d   :  { %652 = vmatmul.mubr.f32.vlgmr.msra.gmra.mrb[0].mxu1 %v119_v17  ;;  %731 = vmatprep.subr.bf16.mxu0 %v830_v0 }
  0x3e   :  { %712 = vmatpush3.bf16.msra.mxu1 %v711_v39  ;;  %662 = vmatprep.mubr.msk.f32.mxu1 %vm831_vm0, %v832_v1 }
  0x3f   :  { %713 = vmatprep.subr.bf16.mxu1 %v830_v0 }
  0x40   :  { %733 = vmatpush3.bf16.msra.mxu0 %v702_v18 }
  0x42   :  { %715 = vmatpush3.bf16.msra.mxu1 %v714_v40 }
  0x43   :  { %696 = vmatmul.mubr.f32.vlgmr.msra.gmra.mrb[0].mxu0 %v119_v17 }
  0x45   :  { %663 = vmatmul.mubr.f32.vlgmr.msra.gmra.mrb[0].mxu1 %v120_v22 }
 0x116   :  { %v531_v41 = vpop.f32.mrb[0].mxu0 }
 0x117   :  { %v697_v42 = vpop.f32.mrb[1].mxu0 }
 0x118   :  { %v296_v43 = vpop.f32.mrb[0].mxu1 }
 0x119   :  { %v734_v44 = vadd.f32 %v531_v41, %v296_v43  ;;  %v664_v45 = vpop.f32.mrb[1].mxu1 }
 0x11b   :  { %575 = vrot.lane.b32.xlu0 %v734_v44, %s833_s1  ;;  %v547_v46 = vmul.f32 %v734_v44, %v734_v44  ;;  %v539_v47 = vsel %vm538_vm2, %v734_v44, 0.0 }
 0x11c   :  { %v540_v48 = vrot.slane %v539_v47, 4 }
 0x11d   :  { %v548_v49 = vsel %vm538_vm2, %v547_v46, 0.0 }
 0x11e   :  { %v541_v50 = vadd.f32 %v540_v48, %v539_v47  ;;  %v549_v51 = vrot.slane %v548_v49, 4 }
 0x120   :  { %v542_v52 = vrot.slane %v541_v50, 2  ;;  %v550_v53 = vadd.f32 %v549_v51, %v548_v49 }
 0x122   :  { %v543_v54 = vadd.f32 %v542_v52, %v541_v50  ;;  %v551_v55 = vrot.slane %v550_v53, 2 }
 0x124   :  { %v544_v56 = vrot.slane %v543_v54, 1  ;;  %v552_v57 = vadd.f32 %v551_v55, %v550_v53 }
 0x126   :  { %v545_v58 = vadd.f32 %v544_v56, %v543_v54  ;;  %v553_v59 = vrot.slane %v552_v57, 1 }
 0x128   :  { %v546_v60 = vmul.f32 0.125, %v545_v58  ;;  %v554_v61 = vadd.f32 %v553_v59, %v552_v57 }
 0x12a   :  { %v555_v62 = vmul.f32 0.125, %v554_v61  ;;  %v556_v63 = vmul.f32 %v546_v60, %v546_v60 }
 0x12c   :  { %v557_v0 = vsub.f32 %v555_v62, %v556_v63 }
 0x12e   :  { %v558_v1 = vadd.f32 1e-05, %v557_v0 }
 0x130   :  { %752 = vrsqrt.f32 %v558_v1 }
 0x13a   :  { %v753_v2 = vpop.eup %752 }
 0x13b   :  { %v560_v5 = vmul.f32 %v753_v2, %v536_v3 }
 0x13d   :  { %v561_v7 = vmul.f32 %v560_v5, %v546_v60  ;;  %v566_v11 = vrot.slane %v560_v5, %v565_v9 }
 0x13f   :  { %v562_v10 = vsub.f32 %v537_v8, %v561_v7  ;;  %v567_v13 = vmul.f32 %v734_v44, %v566_v11 }
 0x141   :  { %v571_v12 = vrot.slane %v562_v10, %v565_v9 }
 0x143   :  { %v572_v14 = vadd.f32 %v571_v12, %v567_v13 }
 0x145   :  { %v573_v15 = vmax.f32 %v572_v14, 0.0 }
 0x18d   :  { %v576_v17 = vpop.permute.xlu0 %575 }
 0x18e   :  { %v578_v18 = vadd.f32 %v576_v17, %v573_v15 }
 0x190   :  { %v583_v19 = vadd.f32 %v601_v16, %v578_v18 }
 0x192   :  { %584 = vst.msk [vmem:[#allocation7] sm:$0xff] %vm538_vm2, %v583_v19 }
 0x193   :  { %809 = shalt.err (!%p806_p6)
}
 0x194   :  { %s810_s21 = scalar_lea.hbm %s937_s3, 128 }
 0x195   :  { %p811_p7 = scmp.ne.s32.totalorder %s937_s3, %s810_s21  ;;  %p814_p8 = scmp.lt.u32.totalorder %s810_s21, %s937_s3 }
 0x197   :  { %p816_p9 = pnand %p814_p8, %p811_p7 }
 0x199   :  { %819 = shalt.err (!%p816_p9)
}
 0x19a   :  { %594 = dma.vmem_to_hbm [thread:$0]  %s592_s17, 128, %s937_s3, [#allocation4]  }
 0x19b   :  { %824 = dma.done.wait [#allocation4], 128  }
 0x19c   :  { %825 = vsyncadd [#allocation4], 4294967168 }
 0x19d   :  { %598 = vsyncpa [#allocation3], 1 }
 0x19e   :  { %599 = vsyncpa [#allocation6], 1 }
 0x19f   :  { %600 = vsyncpa [#allocation4], 1 }

</bundles_post_ra>
